<compile_context>
chip_gen: v7x
topology: tpu7x:2x2x1
jax: 0.10.0
libtpu: 0.0.40
codegen_flags: <defaults>
</compile_context>

<pallas_src>
import functools

import jax
import jax.numpy as jnp
from jax.experimental import pallas as pl
from jax.experimental.pallas import tpu as pltpu


def _varunit_kernel(x_ref, w_ref, b_ref, eps_ref, out_ref, *, z_dim):
    x = x_ref[...]                                           # (tm, in_dim)

    # Fused loc_net + var_net: one MXU matmul into (tm, 2*z_dim).
    pre = jnp.dot(x, w_ref[...], preferred_element_type=jnp.float32)
    pre = pre + b_ref[...]                                   # (tm, 2*z_dim) + (1, 2*z_dim)

    mean = pre[:, :z_dim]                                    # (tm, z_dim)
    pre_v = pre[:, z_dim:]                                   # (tm, z_dim)

    # Numerically-stable softplus: max(x, 0) + log1p(exp(-|x|)).
    var = jnp.maximum(pre_v, 0.0) + jnp.log1p(jnp.exp(-jnp.abs(pre_v)))

    # Normal(mean, var).rsample() == mean + var * eps
    qz = mean + var * eps_ref[...]

    # Single fused store: columns [qz | mean | var].
    out = jnp.concatenate([qz, mean, var], axis=-1)          # (tm, 3*z_dim)
    out_ref[...] = out.astype(out_ref.dtype)


@functools.partial(jax.jit, static_argnames=("tm",))
def varunit_forward(x, w_loc, b_loc, w_var, b_var, eps, *, tm=1024):
    """x: (B, S, in_dim). Returns (qz, mean, var), each (B, S, z_dim)."""
    B, S, in_dim = x.shape
    z_dim = w_loc.shape[1]
    M = B * S

    # Effective row tile: multiple of 8, no larger than the (8-padded) row count.
    m_rounded = ((M + 7) // 8) * 8
    tm_eff = min(((tm + 7) // 8) * 8, m_rounded)
    m_pad = ((M + tm_eff - 1) // tm_eff) * tm_eff

    x2 = x.reshape(M, in_dim)
    eps2 = eps.reshape(M, z_dim)
    if m_pad != M:
        x2 = jnp.pad(x2, ((0, m_pad - M), (0, 0)))
        eps2 = jnp.pad(eps2, ((0, m_pad - M), (0, 0)))

    # Fuse weights/biases: one (in_dim, 2*z_dim) matmul instead of two.
    w_fused = jnp.concatenate([w_loc, w_var], axis=1)        # (in_dim, 2*z_dim)
    b_fused = jnp.concatenate([b_loc, b_var]).reshape(1, 2 * z_dim)

    grid = (m_pad // tm_eff,)
    row_x = pl.BlockSpec((tm_eff, in_dim), lambda i: (i, 0))
    row_eps = pl.BlockSpec((tm_eff, z_dim), lambda i: (i, 0))
    row_out = pl.BlockSpec((tm_eff, 3 * z_dim), lambda i: (i, 0))
    full_w = pl.BlockSpec((in_dim, 2 * z_dim), lambda i: (0, 0))
    full_b = pl.BlockSpec((1, 2 * z_dim), lambda i: (0, 0))

    out = pl.pallas_call(
        functools.partial(_varunit_kernel, z_dim=z_dim),
        out_shape=jax.ShapeDtypeStruct((m_pad, 3 * z_dim), x.dtype),
        grid_spec=pltpu.PrefetchScalarGridSpec(
            num_scalar_prefetch=0,
            grid=grid,
            in_specs=[row_x, full_w, full_b, row_eps],
            out_specs=row_out,
        ),
        compiler_params=pltpu.CompilerParams(
            dimension_semantics=("parallel",)),
    )(x2, w_fused, b_fused, eps2)

    out = out[:M]                                            # drop padded rows
    qz = out[:, :z_dim].reshape(B, S, z_dim)
    mean = out[:, z_dim:2 * z_dim].reshape(B, S, z_dim)
    var = out[:, 2 * z_dim:].reshape(B, S, z_dim)
    return qz, mean, var


def _reference_forward(x, w_loc, b_loc, w_var, b_var, eps):
    mean = jnp.einsum("bsi,iz->bsz", x, w_loc) + b_loc
    var = jax.nn.softplus(jnp.einsum("bsi,iz->bsz", x, w_var) + b_var)
    qz = mean + var * eps
    return qz, mean, var


if __name__ == "__main__":
    key = jax.random.PRNGKey(0)
    B, S, in_dim, z_dim = 2, 8, 32, 16

    k_x, k_wl, k_bl, k_wv, k_bv, k_eps = jax.random.split(key, 6)

    x = jax.random.normal(k_x, (B, S, in_dim), dtype=jnp.float32)

    # Deterministic parameter init (PyTorch Linear default: U(-1/sqrt(in), 1/sqrt(in))).
    bound = 1.0 / (in_dim ** 0.5)
    w_loc = jax.random.uniform(k_wl, (in_dim, z_dim), jnp.float32, -bound, bound)
    b_loc = jax.random.uniform(k_bl, (z_dim,), jnp.float32, -bound, bound)
    w_var = jax.random.uniform(k_wv, (in_dim, z_dim), jnp.float32, -bound, bound)
    b_var = jax.random.uniform(k_bv, (z_dim,), jnp.float32, -bound, bound)

    # rsample noise (generated once, shared by kernel and reference).
    eps = jax.random.normal(k_eps, (B, S, z_dim), dtype=jnp.float32)

    qz, mean, var = varunit_forward(x, w_loc, b_loc, w_var, b_var, eps)
    jax.block_until_ready((qz, mean, var))

    qz_r, mean_r, var_r = _reference_forward(x, w_loc, b_loc, w_var, b_var, eps)
    assert jnp.allclose(mean, mean_r, atol=1e-5, rtol=1e-5)
    assert jnp.allclose(var, var_r, atol=1e-5, rtol=1e-5)
    assert jnp.allclose(qz, qz_r, atol=1e-5, rtol=1e-5)

    print("KERNEL_OK")
</pallas_src>

<mosaic_0001>
module attributes {stable_mosaic.version = 11 : i64} {
  func.func @_varunit_kernel(%arg0: i32, %arg1: memref<16x32xf32, #tpu.memory_space<vmem>>, %arg2: memref<32x32xf32, #tpu.memory_space<vmem>>, %arg3: memref<1x32xf32, #tpu.memory_space<vmem>>, %arg4: memref<16x16xf32, #tpu.memory_space<vmem>>, %arg5: memref<16x48xf32, #tpu.memory_space<vmem>>) attributes {dimension_semantics = [#tpu.dimension_semantics<parallel>], iteration_bounds = array<i64: 1>, scalar_prefetch = 0 : i64, scratch_operands = 0 : i64, tpu.core_type = #tpu.core_type<tc>, window_params = [{transform_indices = @transform_0, window_bounds = array<i64: 16, 32>}, {pipeline_mode = #tpu.pipeline_mode<synchronous>, transform_indices = @transform_1, window_bounds = array<i64: 32, 32>}, {pipeline_mode = #tpu.pipeline_mode<synchronous>, transform_indices = @transform_2, window_bounds = array<i64: 1, 32>}, {transform_indices = @transform_3, window_bounds = array<i64: 16, 16>}, {transform_indices = @transform_4, window_bounds = array<i64: 16, 48>}]} {
    %c0 = arith.constant 0 : index
    %c0_0 = arith.constant 0 : index
    %0 = vector.load %arg1[%c0, %c0_0] : memref<16x32xf32, #tpu.memory_space<vmem>>, vector<16x32xf32>
    %c0_1 = arith.constant 0 : index
    %c0_2 = arith.constant 0 : index
    %1 = vector.load %arg2[%c0_1, %c0_2] : memref<32x32xf32, #tpu.memory_space<vmem>>, vector<32x32xf32>
    %cst = arith.constant dense<0.000000e+00> : vector<16x32xf32>
    %2 = tpu.matmul %0, %1, %cst {dimension_numbers = #tpu.dot_dimension_numbers<[1], [0], [0], [1], [0, 0, 1, 1], [], []>} : vector<16x32xf32>, vector<32x32xf32>, vector<16x32xf32> -> vector<16x32xf32>
    %c0_3 = arith.constant 0 : index
    %c0_4 = arith.constant 0 : index
    %3 = vector.load %arg3[%c0_3, %c0_4] : memref<1x32xf32, #tpu.memory_space<vmem>>, vector<1x32xf32>
    %4 = vector.broadcast %3 : vector<1x32xf32> to vector<16x32xf32>
    %5 = arith.addf %2, %4 : vector<16x32xf32>
    %6 = vector.extract_strided_slice %5 {offsets = [0, 0], sizes = [16, 16], strides = [1, 1]} : vector<16x32xf32> to vector<16x16xf32>
    %7 = vector.extract_strided_slice %5 {offsets = [0, 16], sizes = [16, 16], strides = [1, 1]} : vector<16x32xf32> to vector<16x16xf32>
    %cst_5 = arith.constant 0.000000e+00 : f32
    %8 = vector.broadcast %cst_5 : f32 to vector<16x16xf32>
    %9 = arith.maximumf %7, %8 : vector<16x16xf32>
    %10 = math.absf %7 : vector<16x16xf32>
    %cst_6 = arith.constant 0.000000e+00 : f32
    %11 = vector.broadcast %cst_6 : f32 to vector<16x16xf32>
    %12 = arith.subf %11, %10 : vector<16x16xf32>
    %13 = math.exp %12 : vector<16x16xf32>
    %14 = math.log1p %13 : vector<16x16xf32>
    %15 = arith.addf %9, %14 : vector<16x16xf32>
    %c0_7 = arith.constant 0 : index
    %c0_8 = arith.constant 0 : index
    %16 = vector.load %arg4[%c0_7, %c0_8] : memref<16x16xf32, #tpu.memory_space<vmem>>, vector<16x16xf32>
    %17 = arith.mulf %15, %16 : vector<16x16xf32>
    %18 = arith.addf %6, %17 : vector<16x16xf32>
    %19 = tpu.concatenate %18, %6, %15 in 1 : vector<16x16xf32>, vector<16x16xf32>, vector<16x16xf32> -> vector<16x48xf32>
    %c0_9 = arith.constant 0 : index
    %c0_10 = arith.constant 0 : index
    %20 = vector.load %arg5[%c0_9, %c0_10] : memref<16x48xf32, #tpu.memory_space<vmem>>, vector<16x48xf32>
    tpu.vector_store %arg5[%c0_9, %c0_10], %19 {strides = array<i32>} : memref<16x48xf32, #tpu.memory_space<vmem>>, vector<16x48xf32>,
    return
  }
  func.func @transform_0(%arg0: i32) -> (i32, i32) {
    %c0_i32 = arith.constant 0 : i32
    %c0_i32_0 = arith.constant 0 : i32
    return %arg0, %c0_i32 : i32, i32
  }
  func.func @transform_1(%arg0: i32) -> (i32, i32) {
    %c0_i32 = arith.constant 0 : i32
    %c0_i32_0 = arith.constant 0 : i32
    %c0_i32_1 = arith.constant 0 : i32
    return %c0_i32, %c0_i32_0 : i32, i32
  }
  func.func @transform_2(%arg0: i32) -> (i32, i32) {
    %c0_i32 = arith.constant 0 : i32
    %c0_i32_0 = arith.constant 0 : i32
    %c0_i32_1 = arith.constant 0 : i32
    return %c0_i32, %c0_i32_0 : i32, i32
  }
  func.func @transform_3(%arg0: i32) -> (i32, i32) {
    %c0_i32 = arith.constant 0 : i32
    %c0_i32_0 = arith.constant 0 : i32
    return %arg0, %c0_i32 : i32, i32
  }
  func.func @transform_4(%arg0: i32) -> (i32, i32) {
    %c0_i32 = arith.constant 0 : i32
    %c0_i32_0 = arith.constant 0 : i32
    return %arg0, %c0_i32 : i32, i32
  }
}

</mosaic_0001>

<bundles_post_ra>
// kernel: varunit_forward.1
= control target key start
LH: loop header
LB: loop body
LE: loop exit
PB: predicated region body
PF: predicated region fallthrough
CT: control target
= control target key end

     0   :  { %vm30_vm0 = vcmask 261120   ;;  %s230_s27 = smov 16   ;;  %vm180_vm3 = vcmask 130048   ;;  %vm185_vm4 = vcmask 392192   ;;  %s300_s1 = inlined_call_operand.vmem [shape: f32[32,32], index: 1, kind: input, shape index: {}]   ;;  %s301_s0 = inlined_call_operand.vmem [shape: f32[16,32], index: 0, kind: input, shape index: {}]   ;;  %s302_s3 = inlined_call_operand.vmem [shape: f32[16,16], index: 3, kind: input, shape index: {}]   ;;  %s303_s2 = inlined_call_operand.vmem [shape: f32[1,32], index: 2, kind: input, shape index: {}]   ;;  %s304_s4 = inlined_call_operand.vmem [shape: f32[16,48], index: 4, kind: output, shape index: {}]  }
   0x1   :  { %v19_v0 = vld [vmem:[%s300_s1] sm:$0xff]  ;;  %v20_v1 = vld [vmem:[%s300_s1 + $0x8] sm:$0xff]  ;;  %v21_v2 = vld [vmem:[%s300_s1 + $0x10] sm:$0xff] }
   0x2   :  { %v212_v3 = vpack.c.bf16 %v20_v1, %v19_v0  ;;  %v22_v4 = vld [vmem:[%s300_s1 + $0x18] sm:$0xff]  ;;  %v17_v5 = vld [vmem:[%s301_s0] sm:$0xff]  ;;  %v143_v8 = vld [vmem:[%s302_s3 + $0x8] sm:$0xff] }
   0x3   :  { %v216_v6 = vpack.c.bf16 %v22_v4, %v21_v2  ;;  %209 = vmatprep.mubr.msk.f32.mxu0 %vm30_vm0, %v17_v5  ;;  %v142_v7 = vld [vmem:[%s302_s3] sm:$0xff]  ;;  %v18_v9 = vld [vmem:[%s301_s0 + $0x8] sm:$0xff]  ;;  %s231_s0 = smov 112  }
   0x4   :  { %213 = vmatprep.subr.bf16.mxu0 %v212_v3  ;;  %146 = vrot.lane.b32.xlu0 %v142_v7, %s230_s27  ;;  %v192_v10 = vld [vmem:[%s303_s2] ss:$0 sm:$0xff] }
   0x5   :  { %215 = vmatpush3.bf16.msra.mxu0 %v212_v3 }
   0x6   :  { %217 = vmatprep.subr.bf16.mxu0 %v216_v6 }
   0x8   :  { %148 = vrot.lane.b32.xlu0 %v143_v8, %s230_s27 }
   0x9   :  { %219 = vmatpush3.bf16.msra.mxu0 %v216_v6 }
   0xc   :  { %210 = vmatmul.mubr.msk.f32.vlgmr.msra.gmra.mrb[0].mxu0 %vm30_vm0, %v18_v9 }
  0x76   :  { %v147_v27 = vpop.permute.xlu0 %146 }
  0x7a   :  { %v149_v40 = vpop.permute.xlu0 %148 }
  0xdf   :  { %v211_v11 = vpop.f32.mrb[0].mxu0 }
  0xe0   :  { %v109_v12 = vadd.f32 %v211_v11, %v192_v10  ;;  %v103_v13 = vpop.f32.mrb[1].mxu0 }
  0xe1   :  { %v104_v14 = vadd.f32 %v192_v10, %v103_v13 }
  0xe2   :  { %v115_v15 = vand.u32 2147483647, %v109_v12  ;;  %168 = vrot.lane.b32.xlu1 %v109_v12, %s230_s27  ;;  %v113_v38 = vmax.f32 %v109_v12, 0.0 }
  0xe3   :  { %v114_v16 = vand.u32 2147483647, %v104_v14  ;;  %166 = vrot.lane.b32.xlu0 %v104_v14, %s230_s27  ;;  %v112_v39 = vmax.f32 %v104_v14, 0.0 }
  0xe4   :  { %v117_v17 = vsub.f32 0.0, %v115_v15 }
  0xe5   :  { %v116_v18 = vsub.f32 0.0, %v114_v16 }
  0xe6   :  { %v120_v19 = vmul.f32 1.442695, %v117_v17 }
  0xe7   :  { %v118_v20 = vmul.f32 1.442695, %v116_v18 }
  0xe8   :  { %222 = vpow2.f32 %v120_v19 }
  0xe9   :  { %224 = vpow2.f32 %v118_v20 }
  0xf2   :  { %v223_v21 = vpop.eup %222 }
  0xf3   :  { %v225_v22 = vpop.eup %224  ;;  %v131_v23 = vadd.f32 1.0, %v223_v21  ;;  %v134_v25 = vmul.f32 -0.5, %v223_v21  ;;  %v137_v30 = vand.u32 2147483647, %v223_v21 }
  0xf4   :  { %v122_v24 = vadd.f32 1.0, %v225_v22  ;;  %v125_v26 = vmul.f32 -0.5, %v225_v22  ;;  %v128_v31 = vand.u32 2147483647, %v225_v22 }
  0xf5   :  { %226 = vlog2.f32 %v131_v23  ;;  %v135_v28 = vadd.f32 1.0, %v134_v25  ;;  %vm138_vm1 = vcmp.lt.f32.partialorder %v137_v30, 0.0004427343 }
  0xf6   :  { %228 = vlog2.f32 %v122_v24  ;;  %v126_v29 = vadd.f32 1.0, %v125_v26  ;;  %vm129_vm2 = vcmp.lt.f32.partialorder %v128_v31, 0.0004427343 }
  0xf7   :  { %v136_v35 = vmul.f32 %v223_v21, %v135_v28 }
  0xf8   :  { %v127_v37 = vmul.f32 %v225_v22, %v126_v29 }
  0xff   :  { %v227_v32 = vpop.eup %226 }
 0x100   :  { %v229_v33 = vpop.eup %228  ;;  %v133_v34 = vmul.f32 0.6931472, %v227_v32 }
 0x101   :  { %v124_v36 = vmul.f32 0.6931472, %v229_v33 }
 0x102   :  { %v139_v41 = vsel %vm138_vm1, %v136_v35, %v133_v34 }
 0x103   :  { %v130_v42 = vsel %vm129_vm2, %v127_v37, %v124_v36  ;;  %v141_v43 = vadd.f32 %v139_v41, %v113_v38 }
 0x104   :  { %v140_v44 = vadd.f32 %v130_v42, %v112_v39 }
 0x105   :  { %v153_v45 = vmul.f32 %v149_v40, %v141_v43 }
 0x106   :  { %174 = vrot.lane.b32.xlu0 %v140_v44, %s230_s27  ;;  %v152_v46 = vmul.f32 %v147_v27, %v140_v44 }
 0x107   :  { %158 = vrot.lane.b32.xlu1 %v153_v45, %s231_s0 }
 0x10b   :  { %156 = vrot.lane.b32.xlu1 %v152_v46, %s231_s0 }
 0x10f   :  { %176 = vrot.lane.b32.xlu1 %v141_v43, %s230_s27 }
 0x154   :  { %v169_v47 = vpop.permute.xlu1 %168 }
 0x155   :  { %v167_v49 = vpop.permute.xlu0 %166 }
 0x178   :  { %v175_v53 = vpop.permute.xlu0 %174 }
 0x179   :  { %v159_v48 = vpop.permute.xlu1 %158 }
 0x17a   :  { %v163_v50 = vadd.f32 %v159_v48, %v109_v12 }
 0x17c   :  { %v182_v56 = vsel %vm180_vm3, %v163_v50, %v169_v47 }
 0x17d   :  { %v157_v51 = vpop.permute.xlu1 %156 }
 0x17e   :  { %v162_v52 = vadd.f32 %v157_v51, %v104_v14 }
 0x180   :  { %v181_v54 = vsel %vm180_vm3, %v162_v52, %v167_v49 }
 0x181   :  { %v183_v55 = vsel %vm30_vm0, %v181_v54, %v175_v53  ;;  %v177_v57 = vpop.permute.xlu1 %176 }
 0x182   :  { %186 = vst.msk [vmem:[%s304_s4] sm:$0xff] %vm185_vm4, %v183_v55  ;;  %v184_v58 = vsel %vm30_vm0, %v182_v56, %v177_v57 }
 0x183   :  { %187 = vst.msk [vmem:[%s304_s4 + $0x8] sm:$0xff] %vm185_vm4, %v184_v58 }

</bundles_post_ra>
